<compile_context>
chip_gen: v7x
topology: tpu7x:2x2x1
jax: 0.10.0
libtpu: 0.0.40
codegen_flags: <defaults>
</compile_context>

<pallas_src>
import functools

import jax
import jax.numpy as jnp
from jax import lax
from jax.experimental import pallas as pl
from jax.experimental.pallas import tpu as pltpu

_EPS = 1e-5


def _pge_main_kernel(x_ref, w1c_ref, g1_ref, be1_ref,
                     w2_ref, g2_ref, be2_ref, w3_ref, b3_ref,
                     out_ref,
                     af_ref, bf_ref, ssum_ref, ssq_ref,
                     *, fuse_epilogue):
    N, _F = x_ref.shape
    H = w2_ref.shape[0]
    TM = out_ref.shape[0]

    p = pl.program_id(0)          # pass: 0 = BN2-stats pass, last = emit pass
    t = pl.program_id(1)          # row tile
    npass = pl.num_programs(0)

    # ---- once, at the first grid step: per-node layer-1 terms, BN1 folded ----
    @pl.when((p == 0) & (t == 0))
    def _init():
        ab = jnp.dot(x_ref[...], w1c_ref[...],
                     preferred_element_type=jnp.float32)             # (N, 2H)
        a = ab[:, :H]
        b = ab[:, H:]
        mu_a = jnp.mean(a, axis=0, keepdims=True)
        mu_b = jnp.mean(b, axis=0, keepdims=True)
        var1 = (jnp.mean(jnp.square(a - mu_a), axis=0, keepdims=True)
                + jnp.mean(jnp.square(b - mu_b), axis=0, keepdims=True))
        s1 = g1_ref[...] * lax.rsqrt(var1 + _EPS)
        # BN1(a_i + b_j + b1) == a_i*s1 + (b_j*s1 + shift); b1 cancels exactly.
        af_ref[...] = a * s1
        bf_ref[...] = b * s1 + (be1_ref[...] - (mu_a + mu_b) * s1)
        ssum_ref[...] = jnp.zeros_like(ssum_ref)
        ssq_ref[...] = jnp.zeros_like(ssq_ref)

    # ---- per-tile: ReLU(layer-1) for this tile's rows, then the W2 matmul ----
    row0 = pl.multiple_of(t * TM, TM)
    a_t = af_ref[pl.ds(row0, TM), :]                                  # (TM, H)
    h1 = jnp.maximum(a_t[:, None, :] + bf_ref[...][None, :, :], 0.0)  # (TM,N,H)
    h1 = h1.reshape(TM * N, H).astype(jnp.bfloat16)
    h2 = jnp.dot(h1, w2_ref[...],
                 preferred_element_type=jnp.float32)                  # (TM*N, H)

    # ---- pass 0: accumulate BN2 batch statistics in a single traversal ----
    @pl.when(p == 0)
    def _accumulate():
        ssum_ref[...] += jnp.sum(h2, axis=0, keepdims=True)
        ssq_ref[...] += jnp.sum(h2 * h2, axis=0, keepdims=True)

    # ---- last pass: BN2 + ReLU + Linear(H, 1) -> logits tile ----
    @pl.when(p == npass - 1)
    def _finalize():
        cnt = jnp.float32(N * N)
        mu2 = ssum_ref[...] / cnt
        var2 = jnp.maximum(ssq_ref[...] / cnt - mu2 * mu2, 0.0)
        s2 = g2_ref[...] * lax.rsqrt(var2 + _EPS)
        h2n = jnp.maximum((h2 - mu2) * s2 + be2_ref[...], 0.0)        # (TM*N, H)
        # Linear(H, 1) as a lane reduce -> (TM, N) logits slab directly
        # (avoids a (TM*N,1)->(TM,N) relayout of an MXU column result).
        logit = jnp.sum(h2n.reshape(TM, N, H) * w3_ref[...][None, :, :],
                        axis=-1) + b3_ref[...]                        # (TM, N)
        if fuse_epilogue:   # single tile: TM == N, finish fully in-kernel
            logit = 0.5 * (logit + logit.T)
            adj = jax.nn.sigmoid(logit)
            row = lax.broadcasted_iota(jnp.int32, (TM, N), 0)
            col = lax.broadcasted_iota(jnp.int32, (TM, N), 1)
            out_ref[...] = jnp.where(row == col, jnp.float32(0.0), adj)
        else:
            out_ref[...] = logit


def _sym_epilogue_kernel(l_ref, adj_ref):
    """adj = sigmoid((L + L.T)/2) with a zeroed diagonal (needs full L)."""
    n = l_ref.shape[0]
    logit = l_ref[...]
    s = jax.nn.sigmoid(0.5 * (logit + logit.T))
    row = lax.broadcasted_iota(jnp.int32, (n, n), 0)
    col = lax.broadcasted_iota(jnp.int32, (n, n), 1)
    adj_ref[...] = jnp.where(row == col, jnp.float32(0.0), s)


def _choose_tile_rows(N, H, target_bytes=8 * 2**20):
    """Largest row tile TM (TM | N, TM % 8 == 0 or TM == N) whose (TM*N, H)
    f32 working tile stays under target_bytes (VMEM-safe on v5e/v6e/v7x)."""
    if N * N * H * 4 <= target_bytes:
        return N
    divs = [d for d in range(8, N, 8) if N % d == 0]
    fitting = [d for d in divs if d * N * H * 4 <= target_bytes]
    if fitting:
        return max(fitting)
    if divs:
        return min(divs)
    # TODO(synk): pad the node axis to a multiple of 8 for awkward node counts.
    return N


def pge_forward(x, params, *, tile_rows=None):
    """Pallas-backed PGE.forward (training-mode BatchNorm semantics)."""
    x = x.astype(jnp.float32)
    N, F = x.shape
    H = params["w2"].shape[0]

    # Parameter prep (cheap, outside the kernel).
    w1 = params["w1"]                                    # (2F, H)
    w1c = jnp.concatenate([w1[:F], w1[F:]], axis=1)      # (F, 2H): one MXU push
    w2 = params["w2"].astype(jnp.bfloat16)               # bf16 MXU operand
    w3r = params["w3"].reshape(1, H).astype(jnp.float32)
    b3 = params["b3"].reshape(1, 1).astype(jnp.float32)

    TM = tile_rows if tile_rows is not None else _choose_tile_rows(N, H)
    assert N % TM == 0 and (TM % 8 == 0 or TM == N), (TM, N)
    NT = N // TM
    NPASS = 1 if NT == 1 else 2          # single tile: no recompute pass needed
    fuse = NT == 1

    args = (x, w1c, params["g1"], params["be1"], w2,
            params["g2"], params["be2"], w3r, b3)

    def resident(arr):                   # fully resident, fetched once
        zeros = (0,) * arr.ndim
        return pl.BlockSpec(arr.shape, lambda p, t, _z=zeros: _z)

    tile_bytes = TM * N * H * 4
    resident_bytes = sum(int(a.size) * a.dtype.itemsize for a in args)
    scratch_bytes = 2 * N * H * 4 + 2 * H * 4
    est = (4 * tile_bytes + 2 * resident_bytes + scratch_bytes
           + 4 * TM * N * 4 + (2 << 20))
    vmem_limit = int(min(64 * 2**20, max(32 * 2**20, est)))   # <= v7x physical

    logits = pl.pallas_call(
        functools.partial(_pge_main_kernel, fuse_epilogue=fuse),
        out_shape=jax.ShapeDtypeStruct((N, N), jnp.float32),
        grid=(NPASS, NT),
        in_specs=[resident(a) for a in args],
        # Pass 0 never writes; park its block index at 0 so every output block
        # is written exactly once (in the last pass) with no garbage writeback.
        out_specs=pl.BlockSpec((TM, N), lambda p, t: (p * t, 0)),
        scratch_shapes=[
            pltpu.VMEM((N, H), jnp.float32),   # a * s1          (BN1 folded)
            pltpu.VMEM((N, H), jnp.float32),   # b * s1 + shift  (BN1 folded)
            pltpu.VMEM((1, H), jnp.float32),   # BN2 running sum
            pltpu.VMEM((1, H), jnp.float32),   # BN2 running sum of squares
        ],
        compiler_params=pltpu.CompilerParams(
            # BN2 stats are carried in scratch across row tiles, so the tile
            # axis must stay on one core -> both axes "arbitrary".
            dimension_semantics=("arbitrary", "arbitrary"),
            vmem_limit_bytes=vmem_limit),
    )(*args)

    if fuse:
        return logits

    epi_limit = int(min(64 * 2**20, max(32 * 2**20, 8 * N * N * 4)))
    return pl.pallas_call(
        _sym_epilogue_kernel,
        out_shape=jax.ShapeDtypeStruct((N, N), jnp.float32),
        grid=(1,),
        in_specs=[pl.BlockSpec((N, N), lambda i: (0, 0))],
        out_specs=pl.BlockSpec((N, N), lambda i: (0, 0)),
        compiler_params=pltpu.CompilerParams(
            dimension_semantics=("arbitrary",),
            vmem_limit_bytes=epi_limit),
    )(logits)


def init_params(key, nfeat, nhid):
    """Deterministic init mirroring nn.Linear.reset_parameters / BatchNorm1d."""
    k1, k2, k3 = jax.random.split(key, 3)

    def linear(k, fan_in, fan_out):
        kw, kb = jax.random.split(k)
        bound = 1.0 / jnp.sqrt(jnp.float32(fan_in))
        w = jax.random.uniform(kw, (fan_in, fan_out), jnp.float32, -bound, bound)
        b = jax.random.uniform(kb, (1, fan_out), jnp.float32, -bound, bound)
        return w, b

    w1, b1 = linear(k1, 2 * nfeat, nhid)
    w2, b2 = linear(k2, nhid, nhid)
    w3, b3 = linear(k3, nhid, 1)
    ones = jnp.ones((1, nhid), jnp.float32)
    zeros = jnp.zeros((1, nhid), jnp.float32)
    return {"w1": w1, "b1": b1, "g1": ones, "be1": zeros,
            "w2": w2, "b2": b2, "g2": ones, "be2": zeros,
            "w3": w3, "b3": b3}


def pge_reference(x, p):
    """Pure-JAX f32 reference of the PyTorch forward (training-mode BN)."""
    N, _ = x.shape
    ii = jnp.repeat(jnp.arange(N), N)     # edge_index[0] from product()
    jj = jnp.tile(jnp.arange(N), N)       # edge_index[1]
    e = jnp.concatenate([x[ii], x[jj]], axis=1)

    def bn_relu(h, g, b):
        mu = h.mean(0, keepdims=True)
        var = jnp.square(h - mu).mean(0, keepdims=True)
        return jnp.maximum((h - mu) * lax.rsqrt(var + 1e-5) * g + b, 0.0)

    h = bn_relu(e @ p["w1"] + p["b1"], p["g1"], p["be1"])
    h = bn_relu(h @ p["w2"] + p["b2"], p["g2"], p["be2"])
    adj = (h @ p["w3"] + p["b3"]).reshape(N, N)
    adj = (adj + adj.T) / 2
    adj = jax.nn.sigmoid(adj)
    adj = adj - jnp.diag(jnp.diag(adj))
    return adj


if __name__ == "__main__":
    nfeat, nhid = 16, 128
    k1, k2, k3, k4 = jax.random.split(jax.random.PRNGKey(0), 4)

    # Case 1: typical small graph -> single-tile path with fused epilogue.
    x1 = jax.random.normal(k1, (8, nfeat), jnp.float32)
    p1 = init_params(k2, nfeat, nhid)
    adj1 = jax.block_until_ready(pge_forward(x1, p1))
    ref1 = pge_reference(x1, p1)
    assert adj1.shape == (8, 8)
    err1 = float(jnp.max(jnp.abs(adj1 - ref1)))
    # bf16 W2 matmul => tolerance looser than pure f32 (sigmoid output in [0,1]).
    assert err1 < 5e-3, f"fused path max abs err {err1}"

    # Case 2: force row tiling -> two-pass BN2 stats + separate epilogue kernel.
    x2 = jax.random.normal(k3, (16, nfeat), jnp.float32)
    p2 = init_params(k4, nfeat, nhid)
    adj2 = jax.block_until_ready(pge_forward(x2, p2, tile_rows=8))
    ref2 = pge_reference(x2, p2)
    err2 = float(jnp.max(jnp.abs(adj2 - ref2)))
    assert err2 < 5e-3, f"tiled path max abs err {err2}"

    # TODO(synk): eval-mode BatchNorm (running statistics) not modeled; the
    # module's default training=True forward (batch statistics) is implemented.
    print("KERNEL_OK")
</pallas_src>

<mosaic_0001>
module attributes {stable_mosaic.version = 11 : i64} {
  func.func @_pge_main_kernel(%arg0: i32, %arg1: i32, %arg2: memref<8x16xf32, #tpu.memory_space<vmem>>, %arg3: memref<16x256xf32, #tpu.memory_space<vmem>>, %arg4: memref<1x128xf32, #tpu.memory_space<vmem>>, %arg5: memref<1x128xf32, #tpu.memory_space<vmem>>, %arg6: memref<128x128xbf16, #tpu.memory_space<vmem>>, %arg7: memref<1x128xf32, #tpu.memory_space<vmem>>, %arg8: memref<1x128xf32, #tpu.memory_space<vmem>>, %arg9: memref<1x128xf32, #tpu.memory_space<vmem>>, %arg10: memref<1x1xf32, #tpu.memory_space<vmem>>, %arg11: memref<8x8xf32, #tpu.memory_space<vmem>>, %arg12: memref<8x128xf32, #tpu.memory_space<vmem>>, %arg13: memref<8x128xf32, #tpu.memory_space<vmem>>, %arg14: memref<1x128xf32, #tpu.memory_space<vmem>>, %arg15: memref<1x128xf32, #tpu.memory_space<vmem>>) attributes {dimension_semantics = [#tpu.dimension_semantics<arbitrary>, #tpu.dimension_semantics<arbitrary>], iteration_bounds = array<i64: 1, 1>, scalar_prefetch = 0 : i64, scratch_operands = 4 : i64, tpu.core_type = #tpu.core_type<tc>, window_params = [{pipeline_mode = #tpu.pipeline_mode<synchronous>, transform_indices = @transform_0, window_bounds = array<i64: 8, 16>}, {pipeline_mode = #tpu.pipeline_mode<synchronous>, transform_indices = @transform_1, window_bounds = array<i64: 16, 256>}, {pipeline_mode = #tpu.pipeline_mode<synchronous>, transform_indices = @transform_2, window_bounds = array<i64: 1, 128>}, {pipeline_mode = #tpu.pipeline_mode<synchronous>, transform_indices = @transform_3, window_bounds = array<i64: 1, 128>}, {pipeline_mode = #tpu.pipeline_mode<synchronous>, transform_indices = @transform_4, window_bounds = array<i64: 128, 128>}, {pipeline_mode = #tpu.pipeline_mode<synchronous>, transform_indices = @transform_5, window_bounds = array<i64: 1, 128>}, {pipeline_mode = #tpu.pipeline_mode<synchronous>, transform_indices = @transform_6, window_bounds = array<i64: 1, 128>}, {pipeline_mode = #tpu.pipeline_mode<synchronous>, transform_indices = @transform_7, window_bounds = array<i64: 1, 128>}, {pipeline_mode = #tpu.pipeline_mode<synchronous>, transform_indices = @transform_8, window_bounds = array<i64: 1, 1>}, {transform_indices = @transform_9, window_bounds = array<i64: 8, 8>}]} {
    %c0_i32 = arith.constant 0 : i32
    %0 = arith.cmpi eq, %arg0, %c0_i32 : i32
    %c0_i32_0 = arith.constant 0 : i32
    %1 = arith.cmpi eq, %arg1, %c0_i32_0 : i32
    %2 = arith.andi %0, %1 : i1
    %3 = arith.extui %2 : i1 to i32
    %c0_i32_1 = arith.constant 0 : i32
    %4 = arith.cmpi ne, %3, %c0_i32_1 : i32
    scf.if %4 {
      %c0_11 = arith.constant 0 : index
      %c0_12 = arith.constant 0 : index
      %27 = vector.load %arg2[%c0_11, %c0_12] : memref<8x16xf32, #tpu.memory_space<vmem>>, vector<8x16xf32>
      %c0_13 = arith.constant 0 : index
      %c0_14 = arith.constant 0 : index
      %28 = vector.load %arg3[%c0_13, %c0_14] : memref<16x256xf32, #tpu.memory_space<vmem>>, vector<16x256xf32>
      %cst_15 = arith.constant dense<0.000000e+00> : vector<8x256xf32>
      %29 = tpu.matmul %27, %28, %cst_15 {dimension_numbers = #tpu.dot_dimension_numbers<[1], [0], [0], [1], [0, 0, 1, 1], [], []>} : vector<8x16xf32>, vector<16x256xf32>, vector<8x256xf32> -> vector<8x256xf32>
      %30 = vector.extract_strided_slice %29 {offsets = [0, 0], sizes = [8, 128], strides = [1, 1]} : vector<8x256xf32> to vector<8x128xf32>
      %31 = vector.extract_strided_slice %29 {offsets = [0, 128], sizes = [8, 128], strides = [1, 1]} : vector<8x256xf32> to vector<8x128xf32>
      %cst_16 = arith.constant dense<0.000000e+00> : vector<128xf32>
      %32 = vector.multi_reduction <add>, %30, %cst_16 [0] : vector<8x128xf32> to vector<128xf32>
      %33 = vector.shape_cast %32 : vector<128xf32> to vector<1x128xf32>
      %cst_17 = arith.constant 8.000000e+00 : f32
      %34 = vector.broadcast %cst_17 : f32 to vector<1x128xf32>
      %35 = arith.divf %33, %34 : vector<1x128xf32>
      %cst_18 = arith.constant dense<0.000000e+00> : vector<128xf32>
      %36 = vector.multi_reduction <add>, %31, %cst_18 [0] : vector<8x128xf32> to vector<128xf32>
      %37 = vector.shape_cast %36 : vector<128xf32> to vector<1x128xf32>
      %cst_19 = arith.constant 8.000000e+00 : f32
      %38 = vector.broadcast %cst_19 : f32 to vector<1x128xf32>
      %39 = arith.divf %37, %38 : vector<1x128xf32>
      %40 = vector.broadcast %35 : vector<1x128xf32> to vector<8x128xf32>
      %41 = arith.subf %30, %40 : vector<8x128xf32>
      %42 = arith.mulf %41, %41 : vector<8x128xf32>
      %cst_20 = arith.constant dense<0.000000e+00> : vector<128xf32>
      %43 = vector.multi_reduction <add>, %42, %cst_20 [0] : vector<8x128xf32> to vector<128xf32>
      %44 = vector.shape_cast %43 : vector<128xf32> to vector<1x128xf32>
      %cst_21 = arith.constant 8.000000e+00 : f32
      %45 = vector.broadcast %cst_21 : f32 to vector<1x128xf32>
      %46 = arith.divf %44, %45 : vector<1x128xf32>
      %47 = vector.broadcast %39 : vector<1x128xf32> to vector<8x128xf32>
      %48 = arith.subf %31, %47 : vector<8x128xf32>
      %49 = arith.mulf %48, %48 : vector<8x128xf32>
      %cst_22 = arith.constant dense<0.000000e+00> : vector<128xf32>
      %50 = vector.multi_reduction <add>, %49, %cst_22 [0] : vector<8x128xf32> to vector<128xf32>
      %51 = vector.shape_cast %50 : vector<128xf32> to vector<1x128xf32>
      %cst_23 = arith.constant 8.000000e+00 : f32
      %52 = vector.broadcast %cst_23 : f32 to vector<1x128xf32>
      %53 = arith.divf %51, %52 : vector<1x128xf32>
      %54 = arith.addf %46, %53 : vector<1x128xf32>
      %c0_24 = arith.constant 0 : index
      %c0_25 = arith.constant 0 : index
      %55 = vector.load %arg4[%c0_24, %c0_25] : memref<1x128xf32, #tpu.memory_space<vmem>>, vector<1x128xf32>
      %cst_26 = arith.constant 9.99999974E-6 : f32
      %56 = vector.broadcast %cst_26 : f32 to vector<1x128xf32>
      %57 = arith.addf %54, %56 : vector<1x128xf32>
      %58 = math.rsqrt %57 : vector<1x128xf32>
      %59 = arith.mulf %55, %58 : vector<1x128xf32>
      %60 = vector.broadcast %59 : vector<1x128xf32> to vector<8x128xf32>
      %61 = arith.mulf %30, %60 : vector<8x128xf32>
      %c0_27 = arith.constant 0 : index
      %c0_28 = arith.constant 0 : index
      %62 = vector.load %arg12[%c0_27, %c0_28] : memref<8x128xf32, #tpu.memory_space<vmem>>, vector<8x128xf32>
      tpu.vector_store %arg12[%c0_27, %c0_28], %61 {strides = array<i32>} : memref<8x128xf32, #tpu.memory_space<vmem>>, vector<8x128xf32>,
      %63 = vector.broadcast %59 : vector<1x128xf32> to vector<8x128xf32>
      %64 = arith.mulf %31, %63 : vector<8x128xf32>
      %c0_29 = arith.constant 0 : index
      %c0_30 = arith.constant 0 : index
      %65 = vector.load %arg5[%c0_29, %c0_30] : memref<1x128xf32, #tpu.memory_space<vmem>>, vector<1x128xf32>
      %66 = arith.addf %35, %39 : vector<1x128xf32>
      %67 = arith.mulf %66, %59 : vector<1x128xf32>
      %68 = arith.subf %65, %67 : vector<1x128xf32>
      %69 = vector.broadcast %68 : vector<1x128xf32> to vector<8x128xf32>
      %70 = arith.addf %64, %69 : vector<8x128xf32>
      %c0_31 = arith.constant 0 : index
      %c0_32 = arith.constant 0 : index
      %71 = vector.load %arg13[%c0_31, %c0_32] : memref<8x128xf32, #tpu.memory_space<vmem>>, vector<8x128xf32>
      tpu.vector_store %arg13[%c0_31, %c0_32], %70 {strides = array<i32>} : memref<8x128xf32, #tpu.memory_space<vmem>>, vector<8x128xf32>,
      %cst_33 = arith.constant 0.000000e+00 : f32
      %72 = vector.broadcast %cst_33 : f32 to vector<1x128xf32>
      %c0_34 = arith.constant 0 : index
      %c0_35 = arith.constant 0 : index
      %73 = vector.load %arg14[%c0_34, %c0_35] : memref<1x128xf32, #tpu.memory_space<vmem>>, vector<1x128xf32>
      tpu.vector_store %arg14[%c0_34, %c0_35], %72 {strides = array<i32>} : memref<1x128xf32, #tpu.memory_space<vmem>>, vector<1x128xf32>,
      %cst_36 = arith.constant 0.000000e+00 : f32
      %74 = vector.broadcast %cst_36 : f32 to vector<1x128xf32>
      %c0_37 = arith.constant 0 : index
      %c0_38 = arith.constant 0 : index
      %75 = vector.load %arg15[%c0_37, %c0_38] : memref<1x128xf32, #tpu.memory_space<vmem>>, vector<1x128xf32>
      tpu.vector_store %arg15[%c0_37, %c0_38], %74 {strides = array<i32>} : memref<1x128xf32, #tpu.memory_space<vmem>>, vector<1x128xf32>,
    } else {
    }
    %c8_i32 = arith.constant 8 : i32
    %5 = arith.muli %arg1, %c8_i32 : i32
    %6 = tpu.assume_multiple %5, 8 : i32
    %7 = arith.index_cast %6 : i32 to index
    %c0 = arith.constant 0 : index
    %8 = vector.load %arg12[%7, %c0] : memref<8x128xf32, #tpu.memory_space<vmem>>, vector<8x128xf32>
    %9 = vector.shape_cast %8 : vector<8x128xf32> to vector<8x1x128xf32>
    %c0_2 = arith.constant 0 : index
    %c0_3 = arith.constant 0 : index
    %10 = vector.load %arg13[%c0_2, %c0_3] : memref<8x128xf32, #tpu.memory_space<vmem>>, vector<8x128xf32>
    %11 = vector.shape_cast %10 : vector<8x128xf32> to vector<1x8x128xf32>
    %12 = vector.broadcast %9 : vector<8x1x128xf32> to vector<8x8x128xf32>
    %13 = vector.broadcast %11 : vector<1x8x128xf32> to vector<8x8x128xf32>
    %14 = arith.addf %12, %13 : vector<8x8x128xf32>
    %cst = arith.constant 0.000000e+00 : f32
    %15 = vector.broadcast %cst : f32 to vector<8x8x128xf32>
    %16 = arith.maximumf %14, %15 : vector<8x8x128xf32>
    %17 = vector.shape_cast %16 : vector<8x8x128xf32> to vector<64x128xf32>
    %18 = arith.truncf %17 : vector<64x128xf32> to vector<64x128xbf16>
    %c0_4 = arith.constant 0 : index
    %c0_5 = arith.constant 0 : index
    %19 = vector.load %arg6[%c0_4, %c0_5] : memref<128x128xbf16, #tpu.memory_space<vmem>>, vector<128x128xbf16>
    %cst_6 = arith.constant dense<0.000000e+00> : vector<64x128xf32>
    %20 = tpu.matmul %18, %19, %cst_6 {dimension_numbers = #tpu.dot_dimension_numbers<[1], [0], [0], [1], [0, 0, 1, 1], [], []>} : vector<64x128xbf16>, vector<128x128xbf16>, vector<64x128xf32> -> vector<64x128xf32>
    %c0_i32_7 = arith.constant 0 : i32
    %21 = arith.cmpi eq, %arg0, %c0_i32_7 : i32
    %22 = arith.extui %21 : i1 to i32
    %c0_i32_8 = arith.constant 0 : i32
    %23 = arith.cmpi ne, %22, %c0_i32_8 : i32
    scf.if %23 {
      %c0_11 = arith.constant 0 : index
      %c0_12 = arith.constant 0 : index
      %27 = vector.load %arg14[%c0_11, %c0_12] : memref<1x128xf32, #tpu.memory_space<vmem>>, vector<1x128xf32>
      %cst_13 = arith.constant dense<0.000000e+00> : vector<128xf32>
      %28 = vector.multi_reduction <add>, %20, %cst_13 [0] : vector<64x128xf32> to vector<128xf32>
      %29 = vector.shape_cast %28 : vector<128xf32> to vector<1x128xf32>
      %30 = arith.addf %27, %29 : vector<1x128xf32>
      %c0_14 = arith.constant 0 : index
      %c0_15 = arith.constant 0 : index
      %31 = vector.load %arg14[%c0_14, %c0_15] : memref<1x128xf32, #tpu.memory_space<vmem>>, vector<1x128xf32>
      tpu.vector_store %arg14[%c0_14, %c0_15], %30 {strides = array<i32>} : memref<1x128xf32, #tpu.memory_space<vmem>>, vector<1x128xf32>,
      %c0_16 = arith.constant 0 : index
      %c0_17 = arith.constant 0 : index
      %32 = vector.load %arg15[%c0_16, %c0_17] : memref<1x128xf32, #tpu.memory_space<vmem>>, vector<1x128xf32>
      %33 = arith.mulf %20, %20 : vector<64x128xf32>
      %cst_18 = arith.constant dense<0.000000e+00> : vector<128xf32>
      %34 = vector.multi_reduction <add>, %33, %cst_18 [0] : vector<64x128xf32> to vector<128xf32>
      %35 = vector.shape_cast %34 : vector<128xf32> to vector<1x128xf32>
      %36 = arith.addf %32, %35 : vector<1x128xf32>
      %c0_19 = arith.constant 0 : index
      %c0_20 = arith.constant 0 : index
      %37 = vector.load %arg15[%c0_19, %c0_20] : memref<1x128xf32, #tpu.memory_space<vmem>>, vector<1x128xf32>
      tpu.vector_store %arg15[%c0_19, %c0_20], %36 {strides = array<i32>} : memref<1x128xf32, #tpu.memory_space<vmem>>, vector<1x128xf32>,
    } else {
    }
    %c0_i32_9 = arith.constant 0 : i32
    %24 = arith.cmpi eq, %arg0, %c0_i32_9 : i32
    %25 = arith.extui %24 : i1 to i32
    %c0_i32_10 = arith.constant 0 : i32
    %26 = arith.cmpi ne, %25, %c0_i32_10 : i32
    scf.if %26 {
      %c0_11 = arith.constant 0 : index
      %c0_12 = arith.constant 0 : index
      %27 = vector.load %arg14[%c0_11, %c0_12] : memref<1x128xf32, #tpu.memory_space<vmem>>, vector<1x128xf32>
      %cst_13 = arith.constant 6.400000e+01 : f32
      %28 = vector.broadcast %cst_13 : f32 to vector<1x128xf32>
      %29 = arith.divf %27, %28 : vector<1x128xf32>
      %c0_14 = arith.constant 0 : index
      %c0_15 = arith.constant 0 : index
      %30 = vector.load %arg15[%c0_14, %c0_15] : memref<1x128xf32, #tpu.memory_space<vmem>>, vector<1x128xf32>
      %cst_16 = arith.constant 6.400000e+01 : f32
      %31 = vector.broadcast %cst_16 : f32 to vector<1x128xf32>
      %32 = arith.divf %30, %31 : vector<1x128xf32>
      %33 = arith.mulf %29, %29 : vector<1x128xf32>
      %34 = arith.subf %32, %33 : vector<1x128xf32>
      %cst_17 = arith.constant 0.000000e+00 : f32
      %35 = vector.broadcast %cst_17 : f32 to vector<1x128xf32>
      %36 = arith.maximumf %34, %35 : vector<1x128xf32>
      %c0_18 = arith.constant 0 : index
      %c0_19 = arith.constant 0 : index
      %37 = vector.load %arg7[%c0_18, %c0_19] : memref<1x128xf32, #tpu.memory_space<vmem>>, vector<1x128xf32>
      %cst_20 = arith.constant 9.99999974E-6 : f32
      %38 = vector.broadcast %cst_20 : f32 to vector<1x128xf32>
      %39 = arith.addf %36, %38 : vector<1x128xf32>
      %40 = math.rsqrt %39 : vector<1x128xf32>
      %41 = arith.mulf %37, %40 : vector<1x128xf32>
      %42 = vector.broadcast %29 : vector<1x128xf32> to vector<64x128xf32>
      %43 = arith.subf %20, %42 : vector<64x128xf32>
      %44 = vector.broadcast %41 : vector<1x128xf32> to vector<64x128xf32>
      %45 = arith.mulf %43, %44 : vector<64x128xf32>
      %c0_21 = arith.constant 0 : index
      %c0_22 = arith.constant 0 : index
      %46 = vector.load %arg8[%c0_21, %c0_22] : memref<1x128xf32, #tpu.memory_space<vmem>>, vector<1x128xf32>
      %47 = vector.broadcast %46 : vector<1x128xf32> to vector<64x128xf32>
      %48 = arith.addf %45, %47 : vector<64x128xf32>
      %cst_23 = arith.constant 0.000000e+00 : f32
      %49 = vector.broadcast %cst_23 : f32 to vector<64x128xf32>
      %50 = arith.maximumf %48, %49 : vector<64x128xf32>
      %51 = vector.shape_cast %50 : vector<64x128xf32> to vector<8x8x128xf32>
      %c0_24 = arith.constant 0 : index
      %c0_25 = arith.constant 0 : index
      %52 = vector.load %arg9[%c0_24, %c0_25] : memref<1x128xf32, #tpu.memory_space<vmem>>, vector<1x128xf32>
      %53 = vector.shape_cast %52 : vector<1x128xf32> to vector<1x1x128xf32>
      %54 = vector.broadcast %53 : vector<1x1x128xf32> to vector<8x8x128xf32>
      %55 = arith.mulf %51, %54 : vector<8x8x128xf32>
      %cst_26 = arith.constant dense<0.000000e+00> : vector<8x8xf32>
      %56 = vector.multi_reduction <add>, %55, %cst_26 [2] : vector<8x8x128xf32> to vector<8x8xf32>
      %c0_27 = arith.constant 0 : index
      %c0_28 = arith.constant 0 : index
      %57 = vector.load %arg10[%c0_27, %c0_28] : memref<1x1xf32, #tpu.memory_space<vmem>>, vector<1x1xf32>
      %58 = vector.broadcast %57 : vector<1x1xf32> to vector<8x8xf32>
      %59 = arith.addf %56, %58 : vector<8x8xf32>
      %60 = tpu.transpose %59, [1, 0] : vector<8x8xf32> -> vector<8x8xf32>
      %61 = arith.addf %59, %60 : vector<8x8xf32>
      %cst_29 = arith.constant 5.000000e-01 : f32
      %62 = vector.broadcast %cst_29 : f32 to vector<8x8xf32>
      %63 = arith.mulf %62, %61 : vector<8x8xf32>
      %64 = arith.negf %63 : vector<8x8xf32>
      %65 = math.exp %64 : vector<8x8xf32>
      %cst_30 = arith.constant 1.000000e+00 : f32
      %66 = vector.broadcast %cst_30 : f32 to vector<8x8xf32>
      %67 = arith.addf %66, %65 : vector<8x8xf32>
      %68 = arith.divf %66, %67 : vector<8x8xf32>
      %69 = tpu.iota {dimensions = array<i32: 0>} : vector<8x8xi32>
      %70 = tpu.iota {dimensions = array<i32: 1>} : vector<8x8xi32>
      %71 = arith.cmpi eq, %69, %70 : vector<8x8xi32>
      %cst_31 = arith.constant 0.000000e+00 : f32
      %72 = vector.broadcast %cst_31 : f32 to vector<8x8xf32>
      %73 = arith.select %71, %72, %68 : vector<8x8xi1>, vector<8x8xf32>
      %c0_32 = arith.constant 0 : index
      %c0_33 = arith.constant 0 : index
      %74 = vector.load %arg11[%c0_32, %c0_33] : memref<8x8xf32, #tpu.memory_space<vmem>>, vector<8x8xf32>
      tpu.vector_store %arg11[%c0_32, %c0_33], %73 {strides = array<i32>} : memref<8x8xf32, #tpu.memory_space<vmem>>, vector<8x8xf32>,
    } else {
    }
    return
  }
  func.func @transform_0(%arg0: i32, %arg1: i32) -> (i32, i32) {
    %c0_i32 = arith.constant 0 : i32
    %c0_i32_0 = arith.constant 0 : i32
    %c0_i32_1 = arith.constant 0 : i32
    return %c0_i32, %c0_i32_0 : i32, i32
  }
  func.func @transform_1(%arg0: i32, %arg1: i32) -> (i32, i32) {
    %c0_i32 = arith.constant 0 : i32
    %c0_i32_0 = arith.constant 0 : i32
    %c0_i32_1 = arith.constant 0 : i32
    return %c0_i32, %c0_i32_0 : i32, i32
  }
  func.func @transform_2(%arg0: i32, %arg1: i32) -> (i32, i32) {
    %c0_i32 = arith.constant 0 : i32
    %c0_i32_0 = arith.constant 0 : i32
    %c0_i32_1 = arith.constant 0 : i32
    return %c0_i32, %c0_i32_0 : i32, i32
  }
  func.func @transform_3(%arg0: i32, %arg1: i32) -> (i32, i32) {
    %c0_i32 = arith.constant 0 : i32
    %c0_i32_0 = arith.constant 0 : i32
    %c0_i32_1 = arith.constant 0 : i32
    return %c0_i32, %c0_i32_0 : i32, i32
  }
  func.func @transform_4(%arg0: i32, %arg1: i32) -> (i32, i32) {
    %c0_i32 = arith.constant 0 : i32
    %c0_i32_0 = arith.constant 0 : i32
    %c0_i32_1 = arith.constant 0 : i32
    return %c0_i32, %c0_i32_0 : i32, i32
  }
  func.func @transform_5(%arg0: i32, %arg1: i32) -> (i32, i32) {
    %c0_i32 = arith.constant 0 : i32
    %c0_i32_0 = arith.constant 0 : i32
    %c0_i32_1 = arith.constant 0 : i32
    return %c0_i32, %c0_i32_0 : i32, i32
  }
  func.func @transform_6(%arg0: i32, %arg1: i32) -> (i32, i32) {
    %c0_i32 = arith.constant 0 : i32
    %c0_i32_0 = arith.constant 0 : i32
    %c0_i32_1 = arith.constant 0 : i32
    return %c0_i32, %c0_i32_0 : i32, i32
  }
  func.func @transform_7(%arg0: i32, %arg1: i32) -> (i32, i32) {
    %c0_i32 = arith.constant 0 : i32
    %c0_i32_0 = arith.constant 0 : i32
    %c0_i32_1 = arith.constant 0 : i32
    return %c0_i32, %c0_i32_0 : i32, i32
  }
  func.func @transform_8(%arg0: i32, %arg1: i32) -> (i32, i32) {
    %c0_i32 = arith.constant 0 : i32
    %c0_i32_0 = arith.constant 0 : i32
    %c0_i32_1 = arith.constant 0 : i32
    return %c0_i32, %c0_i32_0 : i32, i32
  }
  func.func @transform_9(%arg0: i32, %arg1: i32) -> (i32, i32) {
    %0 = arith.muli %arg0, %arg1 : i32
    %c0_i32 = arith.constant 0 : i32
    %c0_i32_0 = arith.constant 0 : i32
    return %0, %c0_i32 : i32, i32
  }
}

</mosaic_0001>

<bundles_post_ra>
// kernel: tpu_custom_call.1
= control target key start
LH: loop header
LB: loop body
LE: loop exit
PB: predicated region body
PF: predicated region fallthrough
CT: control target
= control target key end

     0   :  { %s1424_s0 = inlined_call_operand.hbm [shape: f32[8,16], index: 0, kind: input, shape index: {}]   ;;  %s1425_s1 = inlined_call_operand.hbm [shape: f32[16,256], index: 1, kind: input, shape index: {}]   ;;  %s1426_s2 = inlined_call_operand.vmem [shape: f32[1,128], index: 2, kind: input, shape index: {}]   ;;  %s1427_s3 = inlined_call_operand.vmem [shape: f32[1,128], index: 3, kind: input, shape index: {}]   ;;  %s1428_s4 = inlined_call_operand.hbm [shape: bf16[128,128], index: 4, kind: input, shape index: {}]   ;;  %s1429_s5 = inlined_call_operand.vmem [shape: f32[1,128], index: 5, kind: input, shape index: {}]   ;;  %s1430_s6 = inlined_call_operand.vmem [shape: f32[1,128], index: 6, kind: input, shape index: {}]   ;;  %s1431_s7 = inlined_call_operand.vmem [shape: f32[1,128], index: 7, kind: input, shape index: {}]   ;;  %s1432_s8 = inlined_call_operand.<no memory space> [shape: f32[1,1], index: 8, kind: input, shape index: {}]   ;;  %s1433_s9 = inlined_call_operand.hbm [shape: f32[8,8], index: 9, kind: output, shape index: {}]  }
   0x1   :  { %v14_v0 = vstv %s1432_s8 }
   0x2   :  { %15 = vst [vmem:[#allocation6] sm:$0x1] %v14_v0 }
   0x3   :  { %16 = vsyncpa [#allocation8], 0 }
   0x4   :  { %17 = vsyncpa [#allocation11], 0 }
   0x5   :  { %18 = vsyncpa [#allocation9], 0  ;;  %s1163_s11 = smov [#allocation10]   ;;  %s1069_s15 = scalar_lea.hbm %s1425_s1, 512 }
   0x6   :  { %s34_s12 = sshll.u32 %s1163_s11, 4  ;;  %p1070_p0 = scmp.ne.s32.totalorder %s1425_s1, %s1069_s15  ;;  %s35_s12 = int_to_ptr.vmem [resolvable:$true] %s34_s12 }
   0x7   :  { %p1073_p1 = scmp.lt.u32.totalorder %s1069_s15, %s1425_s1 }
   0x9   :  { %p1075_p2 = pnand %p1073_p1, %p1070_p0 }
   0xb   :  { %1078 = shalt.err (!%p1075_p2)
}
   0xc   :  { %s1079_s8 = scalar_lea.vmem %s35_s12, 512  ;;  %p1084_p4 = scmp.lt.s32.totalorder %s35_s12, %s35_s12 }
   0xd   :  { %p1080_p3 = scmp.ne.s32.totalorder %s35_s12, %s1079_s8  ;;  %p1085_p5 = scmp.lt.s32.totalorder %s1079_s8, %s1079_s8 }
   0xf   :  { %p1086_p6 = por %p1085_p5, %p1084_p4 }
  0x11   :  { %p1087_p7 = pnand %p1086_p6, %p1080_p3 }
  0x13   :  { %1090 = shalt.err (!%p1087_p7)
}
  0x14   :  { %s1164_s20 = smov 256   ;;  %s1165_s21 = smov 16  }
  0x15   :  { %40 = dma.hbm_to_vmem [thread:$0]  %s1425_s1, 512, %s35_s12, [#allocation11], %s1164_s20, %s1164_s20, %s1165_s21  }
  0x16   :  { %s1166_s24 = smov [#allocation7]   ;;  %s1167_s26 = smov [#allocation12]  }
  0x17   :  { %s25_s25 = sshll.u32 %s1166_s24, 4  ;;  %s50_s27 = sshll.u32 %s1167_s26, 4  ;;  %s26_s25 = int_to_ptr.vmem [resolvable:$true] %s25_s25  ;;  %s51_s27 = int_to_ptr.vmem [resolvable:$true] %s50_s27 }
  0x18   :  { %s1091_s30 = scalar_lea.hbm %s1424_s0, 128 }
  0x19   :  { %p1092_p8 = scmp.ne.s32.totalorder %s1424_s0, %s1091_s30  ;;  %p1095_p9 = scmp.lt.u32.totalorder %s1091_s30, %s1424_s0 }
  0x1b   :  { %p1097_p10 = pnand %p1095_p9, %p1092_p8 }
  0x1d   :  { %1100 = shalt.err (!%p1097_p10)
}
  0x1e   :  { %s1101_s1 = scalar_lea.vmem %s26_s25, 128  ;;  %p1106_p12 = scmp.lt.s32.totalorder %s26_s25, %s26_s25 }
  0x1f   :  { %p1102_p11 = scmp.ne.s32.totalorder %s26_s25, %s1101_s1  ;;  %p1107_p13 = scmp.lt.s32.totalorder %s1101_s1, %s1101_s1 }
  0x21   :  { %p1108_p0 = por %p1107_p13, %p1106_p12 }
  0x23   :  { %p1109_p1 = pnand %p1108_p0, %p1102_p11 }
  0x25   :  { %1112 = shalt.err (!%p1109_p1)
}
  0x26   :  { %28 = dma.hbm_to_vmem [thread:$0]  %s1424_s0, 128, %s26_s25, [#allocation8]  }
  0x27   :  { %s1113_s18 = scalar_lea.hbm %s1428_s4, 1024 }
  0x28   :  { %p1114_p2 = scmp.ne.s32.totalorder %s1428_s4, %s1113_s18  ;;  %p1117_p3 = scmp.lt.u32.totalorder %s1113_s18, %s1428_s4 }
  0x2a   :  { %p1119_p4 = pnand %p1117_p3, %p1114_p2 }
  0x2c   :  { %1122 = shalt.err (!%p1119_p4)
}
  0x2d   :  { %s1123_s22 = scalar_lea.vmem %s51_s27, 1024  ;;  %p1128_p6 = scmp.lt.s32.totalorder %s51_s27, %s51_s27 }
  0x2e   :  { %p1124_p5 = scmp.ne.s32.totalorder %s51_s27, %s1123_s22  ;;  %p1129_p7 = scmp.lt.s32.totalorder %s1123_s22, %s1123_s22 }
  0x30   :  { %p1130_p8 = por %p1129_p7, %p1128_p6 }
  0x32   :  { %p1131_p9 = pnand %p1130_p8, %p1124_p5 }
  0x34   :  { %1134 = shalt.err (!%p1131_p9)
}
  0x35   :  { %s1168_s0 = smov 64   ;;  %s1169_s23 = smov 4  }
  0x36   :  { %56 = dma.hbm_to_vmem [thread:$0]  %s1428_s4, 1024, %s51_s27, [#allocation11], %s1168_s0, %s1168_s0, %s1169_s23  }
  0x37   :  { %1157 = dma.done.wait [#allocation8], 128  }
  0x38   :  { %1158 = vsyncadd [#allocation8], 4294967168 }
  0x39   :  { %1159 = dma.done.wait [#allocation11], 1536  }
  0x3a   :  { %1160 = vsyncadd [#allocation11], 4294965760  ;;  %v1170_v1 = vmov 0.0   ;;  %v84_v2 = vld [vmem:[#allocation10 + $0x8] sm:$0xff]  ;;  %v86_v3 = vld [vmem:[#allocation10 + $0x18] sm:$0xff]  ;;  %vm87_vm0 = vcmask 130048   ;;  %v201_v54 = vlaneseq }
  0x3b   :  { %155 = vmatprep.mubr.f32.mxu0 %v1170_v1  ;;  %221 = vst [vmem:[#allocation4] sm:$0x1] %v1170_v1  ;;  %222 = vst [vmem:[#allocation5] sm:$0x1] %v1170_v1  ;;  %v83_v4 = vld [vmem:[#allocation10] sm:$0xff]  ;;  %v992_v5 = vpack.c.bf16 %v86_v3, %v84_v2  ;;  %v85_v6 = vld [vmem:[#allocation10 + $0x10] sm:$0xff] }
  0x3c   :  { %v994_v7 = vpack.c.bf16 %v85_v6, %v83_v4  ;;  %v82_v8 = vld [vmem:[#allocation7] sm:$0xff]  ;;  %v1025_v9 = vld [vmem:[#allocation12] sm:$0xff]   ;;  %v1026_v10 = vld [vmem:[#allocation12 + $0x8] sm:$0xff]   ;;  %v1264_v55 = vshrl.u32 %v201_v54, 7  ;;  %v1171_v56 = vmov 1966171168  }
  0x3d   :  { %993 = vmatprep.subr.bf16.mxu0 %v992_v5  ;;  %996 = vmatprep.subr.bf16.mxu1 %v1025_v9  ;;  %v1027_v11 = vld [vmem:[#allocation12 + $0x10] sm:$0xff]   ;;  %v1028_v12 = vld [vmem:[#allocation12 + $0x18] sm:$0xff]   ;;  %v1029_v13 = vld [vmem:[#allocation12 + $0x20] sm:$0xff]   ;;  %v229_v57 = vunpack.c.l.s4 %v1171_v56  ;;  %vm663_vm1 = vcmask 1041409   ;;  %vm665_vm2 = vcmask 1042434   ;;  %vm667_vm3 = vcmask 1043459  }
  0x3e   :  { %995 = vmatpush1.bf16.msra.mxu0 %v994_v7  ;;  %1004 = vmatpush3.bf16.msra.mxu1 %v1025_v9  ;;  %v1030_v14 = vld [vmem:[#allocation12 + $0x28] sm:$0xff]   ;;  %v1031_v15 = vld [vmem:[#allocation12 + $0x30] sm:$0xff]   ;;  %v1032_v16 = vld [vmem:[#allocation12 + $0x38] sm:$0xff]   ;;  %v1270_v59 = vsub.s32 0, %v1264_v55  ;;  %vm669_vm4 = vcmask 1044484   ;;  %vm671_vm5 = vcmask 1045509  }
  0x3f   :  { %968 = vmatprep.subr.bf16.mxu0 %v1025_v9  ;;  %997 = vmatprep.subr.bf16.mxu1 %v1026_v10  ;;  %v196_v58 = vld [vmem:[%s1426_s2] sm:$0x1]  ;;  %v230_v60 = vunpack.c.0.s8 %v229_v57  ;;  %vm673_vm6 = vcmask 1046534   ;;  %vm675_vm7 = vcmask 1047559   ;;  %vm915_vm9 = vcmask 64512  }
  0x40   :  { %v209_v63 = vld [vmem:[%s1427_s3] sm:$0x1] }
  0x41   :  { %936 = vmatmul.mubr.msk.f32.vlgmr.msra.gmra.mrb[0].mxu0 %vm87_vm0, %v82_v8  ;;  %v233_v2 = vsub.s32 %v230_v60, %v1264_v55 }
  0x42   :  { %969 = vmatpush3.bf16.msra.mxu0 %v1025_v9  ;;  %1005 = vmatpush3.bf16.msra.mxu1 %v1026_v10 }
  0x43   :  { %970 = vmatprep.subr.bf16.mxu0 %v1026_v10  ;;  %998 = vmatprep.subr.bf16.mxu1 %v1027_v11 }
  0x46   :  { %971 = vmatpush3.bf16.msra.mxu0 %v1026_v10  ;;  %1006 = vmatpush3.bf16.msra.mxu1 %v1027_v11 }
  0x47   :  { %972 = vmatprep.subr.bf16.mxu0 %v1027_v11  ;;  %999 = vmatprep.subr.bf16.mxu1 %v1028_v12 }
  0x4a   :  { %973 = vmatpush3.bf16.msra.mxu0 %v1027_v11  ;;  %1007 = vmatpush3.bf16.msra.mxu1 %v1028_v12 }
  0x4b   :  { %974 = vmatprep.subr.bf16.mxu0 %v1028_v12  ;;  %1000 = vmatprep.subr.bf16.mxu1 %v1029_v13 }
  0x4e   :  { %975 = vmatpush3.bf16.msra.mxu0 %v1028_v12  ;;  %1008 = vmatpush3.bf16.msra.mxu1 %v1029_v13 }
  0x4f   :  { %976 = vmatprep.subr.bf16.mxu0 %v1029_v13  ;;  %1001 = vmatprep.subr.bf16.mxu1 %v1030_v14 }
  0x52   :  { %977 = vmatpush3.bf16.msra.mxu0 %v1029_v13  ;;  %1009 = vmatpush3.bf16.msra.mxu1 %v1030_v14 }
  0x53   :  { %978 = vmatprep.subr.bf16.mxu0 %v1030_v14  ;;  %1002 = vmatprep.subr.bf16.mxu1 %v1031_v15 }
  0x56   :  { %979 = vmatpush3.bf16.msra.mxu0 %v1030_v14  ;;  %1010 = vmatpush3.bf16.msra.mxu1 %v1031_v15 }
  0x57   :  { %980 = vmatprep.subr.bf16.mxu0 %v1031_v15  ;;  %1003 = vmatprep.subr.bf16.mxu1 %v1032_v16 }
  0x5a   :  { %981 = vmatpush3.bf16.msra.mxu0 %v1031_v15  ;;  %1011 = vmatpush3.bf16.msra.mxu1 %v1032_v16 }
  0x5b   :  { %982 = vmatprep.subr.bf16.mxu0 %v1032_v16 }
  0x5e   :  { %983 = vmatpush3.bf16.msra.mxu0 %v1032_v16 }
 0x114   :  { %v157_v17 = vpop.f32.mrb[0].mxu0 }
 0x115   :  { %v162_v18 = vrot.slane %v157_v17, 4  ;;  %v159_v19 = vpop.f32.mrb[1].mxu0 }
 0x116   :  { %v170_v20 = vrot.slane %v159_v19, 4 }
 0x117   :  { %v163_v21 = vadd.f32 %v162_v18, %v157_v17 }
 0x118   :  { %v171_v22 = vadd.f32 %v170_v20, %v159_v19 }
 0x119   :  { %v164_v23 = vrot.slane %v163_v21, 2 }
 0x11a   :  { %v172_v24 = vrot.slane %v171_v22, 2 }
 0x11b   :  { %v165_v25 = vadd.f32 %v164_v23, %v163_v21 }
 0x11c   :  { %v173_v26 = vadd.f32 %v172_v24, %v171_v22 }
 0x11d   :  { %v166_v27 = vrot.slane %v165_v25, 1 }
 0x11e   :  { %v174_v28 = vrot.slane %v173_v26, 1 }
 0x11f   :  { %v167_v29 = vadd.f32 %v166_v27, %v165_v25 }
 0x120   :  { %v175_v30 = vadd.f32 %v174_v28, %v173_v26 }
 0x121   :  { %v169_v31 = vmul.f32 0.125, %v167_v29 }
 0x122   :  { %v176_v32 = vmul.f32 0.125, %v175_v30 }
 0x123   :  { %v177_v33 = vsub.f32 %v157_v17, %v169_v31 }
 0x124   :  { %v186_v34 = vsub.f32 %v159_v19, %v176_v32  ;;  %v210_v35 = vadd.f32 %v176_v32, %v169_v31 }
 0x125   :  { %v178_v36 = vmul.f32 %v177_v33, %v177_v33 }
 0x126   :  { %v187_v37 = vmul.f32 %v186_v34, %v186_v34 }
 0x127   :  { %v179_v38 = vrot.slane %v178_v36, 4 }
 0x128   :  { %v188_v39 = vrot.slane %v187_v37, 4 }
 0x129   :  { %v180_v40 = vadd.f32 %v179_v38, %v178_v36 }
 0x12a   :  { %v189_v41 = vadd.f32 %v188_v39, %v187_v37 }
 0x12b   :  { %v181_v42 = vrot.slane %v180_v40, 2 }
 0x12c   :  { %v190_v43 = vrot.slane %v189_v41, 2 }
 0x12d   :  { %v182_v44 = vadd.f32 %v181_v42, %v180_v40 }
 0x12e   :  { %v191_v45 = vadd.f32 %v190_v43, %v189_v41 }
 0x12f   :  { %v183_v46 = vrot.slane %v182_v44, 1 }
 0x130   :  { %v192_v47 = vrot.slane %v191_v45, 1 }
 0x131   :  { %v184_v48 = vadd.f32 %v183_v46, %v182_v44 }
 0x132   :  { %v193_v49 = vadd.f32 %v192_v47, %v191_v45 }
 0x133   :  { %v185_v50 = vmul.f32 0.125, %v184_v48 }
 0x134   :  { %v194_v51 = vmul.f32 0.125, %v193_v49  ;;  %v1172_v49 = vmov 0  }
 0x135   :  { %1023 = vset.pattern.permute.xlu0 %v1172_v49 }
 0x136   :  { %v195_v52 = vadd.f32 %v194_v51, %v185_v50 }
 0x138   :  { %v197_v53 = vadd.f32 1e-05, %v195_v52 }
 0x13a   :  { %1033 = vrsqrt.f32 %v197_v53 }
 0x144   :  { %v1034_v61 = vpop.eup %1033 }
 0x145   :  { %v199_v62 = vmul.f32 %v1034_v61, %v196_v58 }
 0x147   :  { %v204_v0 = vrot.slane %v199_v62, %v1270_v59  ;;  %v211_v1 = vmul.f32 %v210_v35, %v199_v62 }
 0x149   :  { %v206_v3 = vmul.f32 %v204_v0, %v157_v17  ;;  %v208_v4 = vmul.f32 %v204_v0, %v159_v19  ;;  %v212_v5 = vsub.f32 %v209_v63, %v211_v1 }
 0x14b   :  { %v217_v6 = vrot.slane %v212_v5, %v1270_v59  ;;  %v234_v7 = vrot.slane %v206_v3, %v233_v2  ;;  %v227_v8 = vcombine.high %v206_v3, %v206_v3 }
 0x14d   :  { %v219_v9 = vadd.f32 %v217_v6, %v208_v4  ;;  %v242_v10 = vcombine.high %v234_v7, %v234_v7  ;;  %v250_v11 = vrot.slane %v234_v7, %v233_v2  ;;  %v241_v12 = vrot.slane %v227_v8, %v233_v2 }
 0x14f   :  { %v264_v13 = vrot.slane %v242_v10, %v233_v2  ;;  %v272_v14 = vcombine.high %v250_v11, %v250_v11  ;;  %v280_v15 = vrot.slane %v250_v11, %v1270_v59  ;;  %v243_v16 = vcombine.high %v241_v12, %v241_v12 }
 0x150   :  { %v257_v18 = vrot.slane %v241_v12, %v233_v2 }
 0x151   :  { %v274_v20 = vcombine.high %v264_v13, %v264_v13  ;;  %v284_v21 = vrot.slane %v264_v13, %v1270_v59  ;;  %v317_v17 = vadd.f32 %v280_v15, %v219_v9  ;;  %v288_v19 = vrot.slane %v272_v14, %v1270_v59 }
 0x152   :  { %v271_v22 = vrot.slane %v243_v16, %v233_v2  ;;  %v273_v23 = vcombine.high %v257_v18, %v257_v18  ;;  %v296_v24 = vrot.slane %v257_v18, %v1270_v59 }
 0x153   :  { %v318_v25 = vadd.f32 %v284_v21, %v219_v9  ;;  %v292_v26 = vrot.slane %v274_v20, %v1270_v59  ;;  %v319_v27 = vadd.f32 %v288_v19, %v219_v9  ;;  %v325_v32 = vmax.f32 %v317_v17, 0.0 }
 0x154   :  { %v275_v28 = vcombine.high %v271_v22, %v271_v22  ;;  %v300_v29 = vrot.slane %v271_v22, %v1270_v59  ;;  %v321_v30 = vadd.f32 %v296_v24, %v219_v9  ;;  %v304_v31 = vrot.slane %v273_v23, %v1270_v59 }
 0x155   :  { %v326_v33 = vmax.f32 %v318_v25, 0.0  ;;  %v320_v34 = vadd.f32 %v292_v26, %v219_v9  ;;  %v327_v39 = vmax.f32 %v319_v27, 0.0 }
 0x156   :  { %v322_v35 = vadd.f32 %v300_v29, %v219_v9  ;;  %v308_v36 = vrot.slane %v275_v28, %v1270_v59  ;;  %v323_v37 = vadd.f32 %v304_v31, %v219_v9  ;;  %v329_v41 = vmax.f32 %v321_v30, 0.0  ;;  %v469_v28 = vld [vmem:[#allocation4] sm:$0x1]  ;;  %v485_v31 = vld [vmem:[#allocation5] sm:$0x1] }
 0x157   :  { %v333_v38 = vpack.c.bf16 %v326_v33, %v325_v32  ;;  %v328_v40 = vmax.f32 %v320_v34, 0.0 }
 0x158   :  { %v330_v42 = vmax.f32 %v322_v35, 0.0  ;;  %v324_v43 = vadd.f32 %v308_v36, %v219_v9  ;;  %v331_v46 = vmax.f32 %v323_v37, 0.0 }
 0x159   :  { %984 = vmatprep.mubr.bf16.mxu0 %v333_v38  ;;  %v334_v44 = vpack.c.bf16 %v328_v40, %v327_v39 }
 0x15a   :  { %v335_v45 = vpack.c.bf16 %v330_v42, %v329_v41  ;;  %v332_v47 = vmax.f32 %v324_v43, 0.0  ;;  %v517_v43 = vld [vmem:[%s1429_s5] sm:$0x1] }
 0x15b   :  { %985 = vmatmul.mubr.bf16.vlgmr.msra.gmra.mrb[4].mxu0 %v334_v44 }
 0x15c   :  { %988 = vmatprep.mubr.bf16.mxu1 %v335_v45  ;;  %v336_v48 = vpack.c.bf16 %v332_v47, %v331_v46 }
 0x15e   :  { %989 = vmatmul.mubr.bf16.vlgmr.msra.gmra.mrb[0].mxu1 %v336_v48 }
 0x22e   :  { %v1287_v50 = vpop.f32.mrb[4].mxu0 }
 0x22f   :  { %v1289_v51 = vpop.f32.mrb[5].mxu0  ;;  %v488_v63 = vmul.f32 %v1287_v50, %v1287_v50 }
 0x230   :  { %v1291_v52 = vpop.f32.mrb[6].mxu0  ;;  %v486_v57 = vmul.f32 %v1289_v51, %v1289_v51 }
 0x231   :  { %v1293_v53 = vpop.f32.mrb[0].mxu1  ;;  %v1295_v56 = vpop.f32.mrb[7].mxu0  ;;  %v489_v3 = vmul.f32 %v1291_v52, %v1291_v52 }
 0x232   :  { %v470_v58 = vadd.f32 %v1295_v56, %v1289_v51  ;;  %v487_v60 = vmul.f32 %v1295_v56, %v1295_v56  ;;  %v1303_v61 = vpop.f32.mrb[1].mxu1  ;;  %v492_v12 = vmul.f32 %v1293_v53, %v1293_v53 }
 0x233   :  { %v1305_v62 = vpop.f32.mrb[2].mxu1  ;;  %v490_v7 = vmul.f32 %v1303_v61, %v1303_v61 }
 0x234   :  { %v471_v0 = vadd.f32 %v1287_v50, %v470_v58  ;;  %v494_v1 = vadd.f32 %v487_v60, %v486_v57  ;;  %v454_v2 = vpop.f32.mrb[3].mxu1  ;;  %v493_v15 = vmul.f32 %v1305_v62, %v1305_v62 }
 0x235   :  { %v491_v11 = vmul.f32 %v454_v2, %v454_v2 }
 0x236   :  { %v495_v4 = vadd.f32 %v494_v1, %v488_v63  ;;  %v472_v5 = vadd.f32 %v1291_v52, %v471_v0  ;;  %v945_v63 = vld [vmem:[%s1430_s6] ss:$0 sm:$0xff]  ;;  %s1173_s6 = smov [#allocation13]  }
 0x238   :  { %v473_v6 = vadd.f32 %v472_v5, %v1303_v61  ;;  %v496_v8 = vadd.f32 %v495_v4, %v489_v3 }
 0x23a   :  { %v497_v9 = vadd.f32 %v496_v8, %v490_v7  ;;  %v474_v10 = vadd.f32 %v473_v6, %v454_v2 }
 0x23c   :  { %v475_v13 = vadd.f32 %v1293_v53, %v474_v10  ;;  %v498_v14 = vadd.f32 %v497_v9, %v491_v11 }
 0x23e   :  { %v476_v16 = vadd.f32 %v1305_v62, %v475_v13  ;;  %v499_v18 = vadd.f32 %v498_v14, %v492_v12 }
 0x240   :  { %v477_v20 = vrot.slane %v476_v16, 4  ;;  %v500_v21 = vadd.f32 %v499_v18, %v493_v15 }
 0x242   :  { %v478_v17 = vadd.f32 %v477_v20, %v476_v16  ;;  %v501_v19 = vrot.slane %v500_v21, 4 }
 0x244   :  { %v479_v22 = vrot.slane %v478_v17, 2  ;;  %v502_v23 = vadd.f32 %v501_v19, %v500_v21 }
 0x246   :  { %v480_v24 = vadd.f32 %v479_v22, %v478_v17  ;;  %v503_v25 = vrot.slane %v502_v23, 2 }
 0x248   :  { %v481_v26 = vrot.slane %v480_v24, 1  ;;  %v504_v27 = vadd.f32 %v503_v25, %v502_v23 }
 0x24a   :  { %v482_v29 = vadd.f32 %v481_v26, %v480_v24  ;;  %v505_v30 = vrot.slane %v504_v27, 1 }
 0x24c   :  { %v483_v32 = vadd.f32 %v482_v29, %v469_v28  ;;  %v506_v33 = vadd.f32 %v505_v30, %v504_v27  ;;  %v947_v30 = vld [vmem:[#allocation6] ss:$0 sm:$0xff] }
 0x24e   :  { %484 = vst [vmem:[#allocation4] sm:$0x1] %v483_v32  ;;  %v507_v34 = vadd.f32 %v506_v33, %v485_v31 }
 0x250   :  { %508 = vst [vmem:[#allocation5] sm:$0x1] %v507_v34 }
 0x255   :  { %v509_v35 = vld [vmem:[#allocation4] sm:$0x1] }
 0x256   :  { %v511_v36 = vmul.f32 0.015625, %v509_v35 }
 0x257   :  { %v512_v37 = vld [vmem:[#allocation5] sm:$0x1] }
 0x258   :  { %v513_v38 = vmul.f32 0.015625, %v512_v37  ;;  %v514_v39 = vmul.f32 %v511_v36, %v511_v36  ;;  %v525_v44 = vrot.slane %v511_v36, %v1270_v59  ;;  %v1341_v36 = vand.u32 127, %v201_v54 }
 0x25a   :  { %v515_v40 = vsub.f32 %v513_v38, %v514_v39  ;;  %v529_v48 = vsub.f32 %v1287_v50, %v525_v44  ;;  %v527_v57 = vsub.f32 %v1289_v51, %v525_v44  ;;  %v530_v58 = vsub.f32 %v1291_v52, %v525_v44  ;;  %v946_v52 = vld [vmem:[%s1431_s7] ss:$0 sm:$0xff]  ;;  %s926_s7 = sshll.u32 %s1173_s6, 4  ;;  %s927_s7 = int_to_ptr.vmem [resolvable:$true] %s926_s7 }
 0x25b   :  { %v532_v60 = vsub.f32 %v454_v2, %v525_v44  ;;  %v528_v0 = vsub.f32 %v1295_v56, %v525_v44  ;;  %v531_v1 = vsub.f32 %v1303_v61, %v525_v44  ;;  %v534_v10 = vsub.f32 %v1305_v62, %v525_v44  ;;  %s1135_s11 = scalar_lea.vmem %s927_s7, 128  ;;  %p1140_p11 = scmp.lt.s32.totalorder %s927_s7, %s927_s7 }
 0x25c   :  { %v516_v41 = vmax.f32 %v515_v40, 0.0  ;;  %v533_v56 = vsub.f32 %v1293_v53, %v525_v44  ;;  %v1345_v39 = vsub.s32 %v1341_v36, %v1264_v55  ;;  %vm841_vm8 = vcmp.eq.s32.totalorder %v1264_v55, %v1341_v36  ;;  %p1136_p10 = scmp.ne.s32.totalorder %s927_s7, %s1135_s11  ;;  %p1141_p12 = scmp.lt.s32.totalorder %s1135_s11, %s1135_s11 }
 0x25e   :  { %v518_v42 = vadd.f32 1e-05, %v516_v41  ;;  %p1142_p13 = por %p1141_p12, %p1140_p11 }
 0x260   :  { %1035 = vrsqrt.f32 %v518_v42  ;;  %p1143_p0 = pnand %p1142_p13, %p1136_p10 }
 0x26a   :  { %v1036_v45 = vpop.eup %1035 }
 0x26b   :  { %v520_v46 = vmul.f32 %v1036_v45, %v517_v43 }
 0x26d   :  { %v539_v47 = vrot.slane %v520_v46, %v1270_v59 }
 0x26f   :  { %v543_v3 = vmul.f32 %v539_v47, %v529_v48  ;;  %v541_v4 = vmul.f32 %v539_v47, %v527_v57  ;;  %v544_v5 = vmul.f32 %v539_v47, %v530_v58  ;;  %v546_v6 = vmul.f32 %v539_v47, %v532_v60 }
 0x270   :  { %v542_v7 = vmul.f32 %v539_v47, %v528_v0  ;;  %v545_v8 = vmul.f32 %v539_v47, %v531_v1  ;;  %v548_v14 = vmul.f32 %v539_v47, %v534_v10  ;;  %v547_v15 = vmul.f32 %v539_v47, %v533_v56 }
 0x271   :  { %v558_v50 = vadd.f32 %v945_v63, %v543_v3  ;;  %v556_v9 = vadd.f32 %v945_v63, %v541_v4  ;;  %v559_v51 = vadd.f32 %v945_v63, %v544_v5  ;;  %v561_v12 = vadd.f32 %v945_v63, %v546_v6 }
 0x272   :  { %v557_v2 = vadd.f32 %v945_v63, %v542_v7  ;;  %v560_v13 = vadd.f32 %v945_v63, %v545_v8  ;;  %v563_v17 = vadd.f32 %v945_v63, %v548_v14  ;;  %v562_v19 = vadd.f32 %v945_v63, %v547_v15 }
 0x273   :  { %v566_v11 = vmax.f32 %v558_v50, 0.0  ;;  %v564_v61 = vmax.f32 %v556_v9, 0.0  ;;  %v567_v20 = vmax.f32 %v559_v51, 0.0  ;;  %v569_v24 = vmax.f32 %v561_v12, 0.0 }
 0x274   :  { %v565_v21 = vmax.f32 %v557_v2, 0.0  ;;  %v568_v62 = vmax.f32 %v560_v13, 0.0  ;;  %v571_v26 = vmax.f32 %v563_v17, 0.0  ;;  %v570_v27 = vmax.f32 %v562_v19, 0.0 }
 0x275   :  { %v581_v16 = vmul.f32 %v946_v52, %v566_v11  ;;  %v579_v18 = vmul.f32 %v946_v52, %v564_v61  ;;  %v582_v22 = vmul.f32 %v946_v52, %v567_v20  ;;  %v584_v53 = vmul.f32 %v946_v52, %v569_v24 }
 0x276   :  { %v580_v23 = vmul.f32 %v946_v52, %v565_v21  ;;  %v583_v25 = vmul.f32 %v946_v52, %v568_v62  ;;  %v586_v28 = vmul.f32 %v946_v52, %v571_v26  ;;  %v585_v29 = vmul.f32 %v946_v52, %v570_v27 }
 0x277   :  { %591 = vadd.xlane.f32.xlu1 %v581_v16  ;;  %587 = vadd.xlane.f32.xlu0 %v579_v18  ;;  %v727_v52 = vsub.s32 2, %v1264_v55  ;;  %v720_v11 = vsub.s32 1, %v1264_v55  ;;  %v734_v12 = vsub.s32 3, %v1264_v55  ;;  %v741_v14 = vsub.s32 4, %v1264_v55 }
 0x278   :  { %v755_v18 = vsub.s32 6, %v1264_v55  ;;  %v762_v20 = vsub.s32 7, %v1264_v55 }
 0x27b   :  { %593 = vadd.xlane.f32.xlu1 %v582_v22  ;;  %589 = vadd.xlane.f32.xlu0 %v580_v23 }
 0x27f   :  { %597 = vadd.xlane.f32.xlu1 %v584_v53  ;;  %595 = vadd.xlane.f32.xlu0 %v583_v25 }
 0x283   :  { %601 = vadd.xlane.f32.xlu1 %v586_v28  ;;  %599 = vadd.xlane.f32.xlu0 %v585_v29 }
 0x299   :  { %610 = vperm.xlu0 %1023, %v947_v30  }
 0x304   :  { %v588_v31 = vpop.xlane.xlu0 %587  ;;  %v592_v33 = vpop.xlane.xlu1 %591 }
 0x308   :  { %v590_v32 = vpop.xlane.xlu0 %589  ;;  %v594_v35 = vpop.xlane.xlu1 %593 }
 0x30c   :  { %v596_v34 = vpop.xlane.xlu0 %595  ;;  %v598_v38 = vpop.xlane.xlu1 %597 }
 0x310   :  { %v600_v37 = vpop.xlane.xlu0 %599  ;;  %v602_v57 = vpop.xlane.xlu1 %601 }
 0x318   :  { %v611_v40 = vpop.permute.xlu0 %610 }
 0x319   :  { %v613_v41 = vadd.f32 %v611_v40, %v588_v31  ;;  %v1347_v42 = vadd.f32 %v611_v40, %v590_v32  ;;  %v615_v43 = vadd.f32 %v611_v40, %v592_v33  ;;  %v1349_v44 = vadd.f32 %v611_v40, %v594_v35 }
 0x31a   :  { %v1351_v45 = vadd.f32 %v611_v40, %v596_v34  ;;  %v1353_v46 = vadd.f32 %v611_v40, %v598_v38  ;;  %v1359_v58 = vadd.f32 %v611_v40, %v600_v37  ;;  %v1361_v60 = vadd.f32 %v611_v40, %v602_v57 }
 0x31b   :  { %v634_v54 = vrot.slane %v613_v41, %v1345_v39  ;;  %v638_v47 = vrot.slane %v1347_v42, %v1345_v39  ;;  %v642_v48 = vrot.slane %v615_v43, %v1345_v39  ;;  %v646_v63 = vrot.slane %v1349_v44, %v1345_v39 }
 0x31c   :  { %v650_v1 = vrot.slane %v1351_v45, %v1345_v39  ;;  %v654_v4 = vrot.slane %v1353_v46, %v1345_v39  ;;  %v658_v6 = vrot.slane %v1359_v58, %v1345_v39  ;;  %v662_v8 = vrot.slane %v1361_v60, %v1345_v39 }
 0x31d   :  { %v664_v0 = vsel %vm663_vm1, %v638_v47, %v634_v54 }
 0x31e   :  { %v666_v3 = vsel %vm665_vm2, %v642_v48, %v664_v0 }
 0x31f   :  { %v668_v5 = vsel %vm667_vm3, %v646_v63, %v666_v3 }
 0x320   :  { %v670_v7 = vsel %vm669_vm4, %v650_v1, %v668_v5 }
 0x321   :  { %v672_v50 = vsel %vm671_vm5, %v654_v4, %v670_v7 }
 0x322   :  { %v674_v9 = vsel %vm673_vm6, %v658_v6, %v672_v50 }
 0x323   :  { %v676_v51 = vsel %vm675_vm7, %v662_v8, %v674_v9 }
 0x324   :  { %678 = vxpose.xlu1.b32.start.end [1/1] (short) (narrow) %v676_v51, 8 }
 0x342   :  { %1024 = vset.pattern.permute.xlu1 %v1172_v49  ;;  %v748_v49 = vsub.s32 5, %v1264_v55 }
 0x3a4   :  { %v694_v2 = vpop.trf.xlu1 }
 0x3a5   :  { %v728_v10 = vrot.slane %v694_v2, %v727_v52  ;;  %v714_v56 = vrot.slane %v694_v2, %v1270_v59  ;;  %v721_v61 = vrot.slane %v694_v2, %v720_v11  ;;  %v735_v13 = vrot.slane %v694_v2, %v734_v12 }
 0x3a6   :  { %v742_v15 = vrot.slane %v694_v2, %v741_v14  ;;  %v749_v16 = vrot.slane %v694_v2, %v748_v49  ;;  %v756_v59 = vrot.slane %v694_v2, %v755_v18  ;;  %v763_v21 = vrot.slane %v694_v2, %v762_v20 }
 0x3a7   :  { %730 = vbcast.lane.b32.xlu1 %v728_v10, 256  ;;  %716 = vbcast.lane.b32.xlu0 %v714_v56, 256 }
 0x3ab   :  { %723 = vbcast.lane.b32.xlu0 %v721_v61, 256 }
 0x3af   :  { %737 = vbcast.lane.b32.xlu0 %v735_v13, 256 }
 0x3b3   :  { %744 = vbcast.lane.b32.xlu0 %v742_v15, 256 }
 0x3b7   :  { %751 = vbcast.lane.b32.xlu0 %v749_v16, 256 }
 0x3bb   :  { %758 = vbcast.lane.b32.xlu0 %v756_v59, 256 }
 0x3bf   :  { %765 = vbcast.lane.b32.xlu0 %v763_v21, 256 }
 0x419   :  { %v731_v17 = vpop.permute.xlu1 %730  ;;  %v717_v19 = vpop.permute.xlu0 %716 }
 0x41a   :  { %v777_v22 = vadd.f32 %v731_v17, %v615_v43  ;;  %v775_v23 = vadd.f32 %v717_v19, %v613_v41 }
 0x41c   :  { %v948_v24 = vmul.f32 -0.5, %v775_v23  ;;  %v950_v62 = vmul.f32 -0.5, %v777_v22 }
 0x41d   :  { %v724_v53 = vpop.permute.xlu0 %723 }
 0x41e   :  { %v799_v25 = vmul.f32 1.442695, %v948_v24  ;;  %v776_v26 = vadd.f32 %v724_v53, %v1347_v42  ;;  %v803_v28 = vmul.f32 1.442695, %v950_v62 }
 0x420   :  { %v949_v27 = vmul.f32 -0.5, %v776_v26  ;;  %1037 = vpow2.f32 %v799_v25 }
 0x421   :  { %v738_v29 = vpop.permute.xlu0 %737 }
 0x422   :  { %v801_v30 = vmul.f32 1.442695, %v949_v27  ;;  %v778_v31 = vadd.f32 %v738_v29, %v1349_v44 }
 0x424   :  { %1039 = vpow2.f32 %v801_v30  ;;  %v951_v32 = vmul.f32 -0.5, %v778_v31 }
 0x425   :  { %1041 = vpow2.f32 %v803_v28  ;;  %v745_v33 = vpop.permute.xlu0 %744 }
 0x426   :  { %v805_v34 = vmul.f32 1.442695, %v951_v32  ;;  %v779_v35 = vadd.f32 %v745_v33, %v1351_v45 }
 0x428   :  { %1043 = vpow2.f32 %v805_v34  ;;  %v952_v37 = vmul.f32 -0.5, %v779_v35 }
 0x429   :  { %v752_v38 = vpop.permute.xlu0 %751 }
 0x42a   :  { %v807_v40 = vmul.f32 1.442695, %v952_v37  ;;  %v780_v41 = vadd.f32 %v752_v38, %v1353_v46  ;;  %v1038_v42 = vpop.eup %1037 }
 0x42b   :  { %v815_v43 = vadd.f32 1.0, %v1038_v42 }
 0x42c   :  { %1045 = vpow2.f32 %v807_v40  ;;  %v953_v54 = vmul.f32 -0.5, %v780_v41 }
 0x42d   :  { %v759_v47 = vpop.permute.xlu0 %758  ;;  %1047 = vrcp.f32 %v815_v43 }
 0x42e   :  { %v1040_v48 = vpop.eup %1039  ;;  %v809_v44 = vmul.f32 1.442695, %v953_v54  ;;  %v781_v57 = vadd.f32 %v759_v47, %v1359_v58 }
 0x42f   :  { %v1042_v63 = vpop.eup %1041  ;;  %v816_v0 = vadd.f32 1.0, %v1040_v48 }
 0x430   :  { %1049 = vpow2.f32 %v809_v44  ;;  %v954_v45 = vmul.f32 -0.5, %v781_v57  ;;  %v817_v4 = vadd.f32 1.0, %v1042_v63 }
 0x431   :  { %1051 = vrcp.f32 %v816_v0  ;;  %v766_v1 = vpop.permute.xlu0 %765 }
 0x432   :  { %v1044_v3 = vpop.eup %1043  ;;  %v811_v5 = vmul.f32 1.442695, %v954_v45  ;;  %v782_v46 = vadd.f32 %v766_v1, %v1361_v60 }
 0x433   :  { %v818_v6 = vadd.f32 1.0, %v1044_v3 }
 0x434   :  { %1053 = vpow2.f32 %v811_v5  ;;  %v955_v7 = vmul.f32 -0.5, %v782_v46 }
 0x435   :  { %1055 = vrcp.f32 %v818_v6 }
 0x436   :  { %v1046_v8 = vpop.eup %1045  ;;  %1057 = vrcp.f32 %v817_v4  ;;  %v813_v50 = vmul.f32 1.442695, %v955_v7 }
 0x437   :  { %v819_v9 = vadd.f32 1.0, %v1046_v8  ;;  %v1048_v58 = vpop.eup %1047 }
 0x438   :  { %1059 = vpow2.f32 %v813_v50  ;;  %851 = vperm.xlu0 %1023, %v1048_v58  }
 0x439   :  { %1061 = vrcp.f32 %v819_v9 }
 0x43a   :  { %v1050_v51 = vpop.eup %1049 }
 0x43b   :  { %v1052_v52 = vpop.eup %1051  ;;  %v820_v2 = vadd.f32 1.0, %v1050_v51 }
 0x43c   :  { %854 = vperm.xlu0 %1023, %v1052_v52  }
 0x43d   :  { %1063 = vrcp.f32 %v820_v2 }
 0x43e   :  { %v1054_v10 = vpop.eup %1053 }
 0x43f   :  { %v1056_v56 = vpop.eup %1055  ;;  %v821_v60 = vadd.f32 1.0, %v1054_v10 }
 0x440   :  { %v1058_v11 = vpop.eup %1057  ;;  %860 = vperm.xlu1 %1024, %v1056_v56  }
 0x441   :  { %1065 = vrcp.f32 %v821_v60  ;;  %857 = vperm.xlu0 %1023, %v1058_v11  }
 0x442   :  { %v1060_v61 = vpop.eup %1059 }
 0x443   :  { %v1062_v12 = vpop.eup %1061  ;;  %v822_v13 = vadd.f32 1.0, %v1060_v61 }
 0x445   :  { %1067 = vrcp.f32 %v822_v13  ;;  %863 = vperm.xlu0 %1023, %v1062_v12  }
 0x447   :  { %v1064_v14 = vpop.eup %1063 }
 0x448   :  { %866 = vperm.xlu1 %1024, %v1064_v14  }
 0x44b   :  { %v1066_v15 = vpop.eup %1065 }
 0x44c   :  { %869 = vperm.xlu0 %1023, %v1066_v15  }
 0x44f   :  { %v1068_v49 = vpop.eup %1067 }
 0x450   :  { %872 = vperm.xlu1 %1024, %v1068_v49  }
 0x4b7   :  { %v852_v16 = vpop.permute.xlu0 %851 }
 0x4b8   :  { %v877_v22 = vrot.slane %v852_v16, %v1345_v39 }
 0x4bb   :  { %v855_v18 = vpop.permute.xlu0 %854 }
 0x4bc   :  { %v881_v21 = vrot.slane %v855_v18, %v1345_v39 }
 0x4be   :  { %v906_v24 = vsel %vm663_vm1, %v881_v21, %v877_v22 }
 0x4bf   :  { %v861_v20 = vpop.permute.xlu1 %860 }
 0x4c0   :  { %v858_v59 = vpop.permute.xlu0 %857  ;;  %v889_v62 = vrot.slane %v861_v20, %v1345_v39 }
 0x4c1   :  { %v885_v17 = vrot.slane %v858_v59, %v1345_v39 }
 0x4c3   :  { %v907_v53 = vsel %vm665_vm2, %v885_v17, %v906_v24 }
 0x4c4   :  { %v864_v19 = vpop.permute.xlu0 %863  ;;  %v908_v29 = vsel %vm667_vm3, %v889_v62, %v907_v53 }
 0x4c5   :  { %v893_v25 = vrot.slane %v864_v19, %v1345_v39 }
 0x4c7   :  { %v867_v23 = vpop.permute.xlu1 %866  ;;  %v909_v30 = vsel %vm669_vm4, %v893_v25, %v908_v29 }
 0x4c8   :  { %v897_v27 = vrot.slane %v867_v23, %v1345_v39 }
 0x4ca   :  { %v910_v32 = vsel %vm671_vm5, %v897_v27, %v909_v30 }
 0x4cb   :  { %v870_v26 = vpop.permute.xlu0 %869 }
 0x4cc   :  { %v901_v28 = vrot.slane %v870_v26, %v1345_v39 }
 0x4ce   :  { %v911_v34 = vsel %vm673_vm6, %v901_v28, %v910_v32 }
 0x4cf   :  { %v873_v31 = vpop.permute.xlu1 %872 }
 0x4d0   :  { %v905_v33 = vrot.slane %v873_v31, %v1345_v39 }
 0x4d2   :  { %v912_v35 = vsel %vm675_vm7, %v905_v33, %v911_v34 }
 0x4d3   :  { %v914_v37 = vsel %vm841_vm8, 0.0, %v912_v35 }
 0x4d4   :  { %916 = vst.msk [vmem:[#allocation13] sm:$0xff] %vm915_vm9, %v914_v37 }
 0x4d5   :  { %1146 = shalt.err (!%p1143_p0)
}
 0x4d6   :  { %s1147_s1 = scalar_lea.hbm %s1433_s9, 128 }
 0x4d7   :  { %p1148_p1 = scmp.ne.s32.totalorder %s1433_s9, %s1147_s1  ;;  %p1151_p2 = scmp.lt.u32.totalorder %s1147_s1, %s1433_s9 }
 0x4d9   :  { %p1153_p3 = pnand %p1151_p2, %p1148_p1 }
 0x4db   :  { %1156 = shalt.err (!%p1153_p3)
}
 0x4dc   :  { %929 = dma.vmem_to_hbm [thread:$0]  %s927_s7, 128, %s1433_s9, [#allocation9]  }
 0x4dd   :  { %1161 = dma.done.wait [#allocation9], 128  }
 0x4de   :  { %1162 = vsyncadd [#allocation9], 4294967168 }
 0x4df   :  { %933 = vsyncpa [#allocation8], 1 }
 0x4e0   :  { %934 = vsyncpa [#allocation11], 1 }
 0x4e1   :  { %935 = vsyncpa [#allocation9], 1 }

</bundles_post_ra>
